<compile_context>
chip_gen: v7x
topology: tpu7x:2x2x1
jax: 0.10.0
libtpu: 0.0.40
codegen_flags: <defaults>
</compile_context>

<pallas_src>
from functools import partial

import numpy as np
import jax
import jax.numpy as jnp
from jax.experimental import pallas as pl
from jax.experimental.pallas import tpu as pltpu


def _round_up(x, m):
    return ((x + m - 1) // m) * m


def _choose_spatial_tile(s128, C, bs, target_bytes=8 * 1024 * 1024):
    """Pick a lane tile (multiple of 128): as large as possible while the
    double-buffered in+out(+grid-table) working set stays under target_bytes.
    8 MiB keeps us inside v5e's 16 MiB scoped-VMEM default and well inside
    v7x's 64 MiB physical VMEM without touching vmem_limit_bytes."""
    per_lane_bytes = 2 * (4 * C + 4 * C + 4 * 2)   # 2 buffers x (in + out + grid) per lane, f32
    budget = max(128, (target_bytes // per_lane_bytes) // 128 * 128)
    tile = min(s128, budget)
    # v7x has 2 TensorCores per chip: with bs == 1 make sure the spatial axis
    # still yields >= 2 grid steps so both cores get work (no effect v5e/v6e).
    if bs == 1 and tile == s128 and s128 % 256 == 0:
        tile = max(128, s128 // 2)
    return tile


def _yolo_kernel(code_ref, grid_ref, p_ref, io_ref, *, stride, cpa, anchors_wh):
    """One (batch, spatial-tile) block.

    code_ref : VMEM (C, 1) f32      -- per-channel op code: 0=x, 1=y, 2=w, 3=h, 4=rest
    grid_ref : VMEM (2, T) f32      -- row 0 = grid col (gx), row 1 = grid row (gy)
    p_ref    : VMEM (C, T)          -- raw predictions, all anchors/channels
    io_ref   : VMEM (C, T)          -- decoded output (same channel-major layout)
    """
    x = p_ref[...].astype(jnp.float32)               # (C, T) full-width load
    sig = jax.nn.sigmoid(x)                          # EUP, needed for most rows

    col = grid_ref[0:1, :]                           # (1, T)
    row = grid_ref[1:2, :]                           # (1, T)

    code = code_ref[...]                             # (C, 1)
    is_y = code == 1.0
    is_xy = code < 2.0
    mul_c = jnp.where(is_xy, stride, 1.0)            # (C, 1) stride for x/y, 1 otherwise
    add_c = jnp.where(is_xy, stride, 0.0)            # (C, 1) stride for x/y, 0 otherwise

    gridv = jnp.where(is_y, row, col)                # single full-width select
    out = sig * mul_c + gridv * add_c                # FMA-shaped epilogue
    io_ref[...] = out.astype(io_ref.dtype)           # full-width lane-dense store

    # w/h rows only: exp(x) * anchor_pixels (anchor_vec * stride == anchors).
    # 2*nA single-sublane rows => tiny EUP / store cost vs. the full block.
    for a, (aw, ah) in enumerate(anchors_wh):
        r = a * cpa + 2
        io_ref[r:r + 1, :] = (jnp.exp(x[r:r + 1, :]) * aw).astype(io_ref.dtype)
        io_ref[r + 1:r + 2, :] = (jnp.exp(x[r + 1:r + 2, :]) * ah).astype(io_ref.dtype)


def yolo_layer_forward(p, anchors, nC, img_size, *, return_p=True,
                       channel_major_io=False):
    """Pallas implementation of YOLOLayer.forward (eval mode).

    p       : (bs, nA*(nC+5), nG, nG) float32/bfloat16   (NCHW, like torch)
    anchors : (nA, 2) anchor boxes in image pixels (concrete, not traced)
    Returns (io, p_perm) with
      io     : (bs, nA*nG*nG, 5+nC)   (or (bs, C, nG*nG) if channel_major_io)
      p_perm : (bs, nA, nG, nG, nC+5) (only if return_p)
    """
    bs, ch, nG, nG2 = p.shape
    assert nG == nG2
    anchors_np = np.asarray(anchors, dtype=np.float32)   # anchors are static config
    nA = anchors_np.shape[0]
    CpA = nC + 5
    assert ch == nA * CpA
    C = ch
    S = nG * nG
    stride = float(img_size) / float(nG)

    # --- lane-dense padding & tiling --------------------------------------
    S128 = _round_up(S, 128)
    tile_s = _choose_spatial_tile(S128, C, bs)
    S_pad = _round_up(S128, tile_s)
    n_sp = S_pad // tile_s

    # --- tiny static metadata ----------------------------------------------
    # per-channel op code: 0=x, 1=y, 2=w, 3=h, 4=obj/class
    code_per = np.concatenate([np.array([0.0, 1.0, 2.0, 3.0], np.float32),
                               np.full((CpA - 4,), 4.0, np.float32)])
    code = jnp.asarray(np.tile(code_per, nA).reshape(C, 1))

    # (2, S_pad) grid-cell table: row 0 = col (grid_x), row 1 = row (grid_y).
    s_idx = np.arange(S_pad)
    grid_tab = jnp.asarray(
        np.stack([s_idx % nG, s_idx // nG]).astype(np.float32))

    # compile-time anchor pixel coefficients (anchor_vec * stride == anchors)
    anchors_wh = tuple((float(w), float(h)) for w, h in anchors_np)

    # --- channel-major, lane-dense view of p --------------------------------
    p_flat = p.reshape(bs, C, S)                      # contiguous reshape, free
    if S_pad != S:
        p_flat = jnp.pad(p_flat, ((0, 0), (0, 0), (0, S_pad - S)))

    io_flat = pl.pallas_call(
        partial(_yolo_kernel, stride=stride, cpa=CpA, anchors_wh=anchors_wh),
        out_shape=jax.ShapeDtypeStruct((bs, C, S_pad), p.dtype),
        grid=(bs, n_sp),
        in_specs=[
            pl.BlockSpec((C, 1), lambda b, j: (0, 0)),               # channel codes
            pl.BlockSpec((2, tile_s), lambda b, j: (0, j)),          # grid col/row table
            pl.BlockSpec((None, C, tile_s), lambda b, j: (b, 0, j)),  # predictions
        ],
        out_specs=pl.BlockSpec((None, C, tile_s), lambda b, j: (b, 0, j)),
        compiler_params=pltpu.CompilerParams(
            dimension_semantics=("parallel", "parallel")),
    )(code, grid_tab, p_flat)

    if S_pad != S:
        io_flat = io_flat[:, :, :S]

    if channel_major_io:
        # Fused consumers can read this directly and skip the layout transpose.
        io = io_flat
    else:
        # Channel-last layout required by the torch API (.permute(0,1,3,4,2)).
        # Pure layout plumbing done by XLA outside the kernel.
        io = jnp.transpose(io_flat.reshape(bs, nA, CpA, nG, nG),
                           (0, 1, 3, 4, 2)).reshape(bs, -1, CpA)

    if not return_p:
        return io

    # Second torch return value: the raw predictions, channel-last. Skip via
    # return_p=False in pure inference paths (saves a full HBM read+write).
    p_perm = jnp.transpose(p.reshape(bs, nA, CpA, nG, nG), (0, 1, 3, 4, 2))
    return io, p_perm


def yolo_layer_ref(p, anchors, nC, img_size):
    """Pure-JAX reference for correctness checking (mirrors the torch code)."""
    bs, ch, nG, _ = p.shape
    nA = anchors.shape[0]
    stride = float(img_size) / float(nG)
    p5 = jnp.transpose(p.reshape(bs, nA, nC + 5, nG, nG), (0, 1, 3, 4, 2))
    gx = jnp.broadcast_to(jnp.arange(nG, dtype=jnp.float32)[None, :], (nG, nG))
    gy = jnp.broadcast_to(jnp.arange(nG, dtype=jnp.float32)[:, None], (nG, nG))
    grid_xy = jnp.stack([gx, gy], axis=-1)[None, None]            # (1,1,nG,nG,2)
    anchor_wh = (anchors / stride).reshape(1, nA, 1, 1, 2)
    xy = (jax.nn.sigmoid(p5[..., 0:2]) + grid_xy) * stride
    wh = jnp.exp(p5[..., 2:4]) * anchor_wh * stride
    rest = jax.nn.sigmoid(p5[..., 4:])
    io = jnp.concatenate([xy, wh, rest], axis=-1)
    return io.reshape(bs, -1, 5 + nC), p5


if __name__ == "__main__":
    # Small, deterministic configuration
    nC = 3                       # number of classes
    nA = 3                       # number of anchors
    nG = 16                      # feature-map size
    bs = 2
    img_size = 64                # => stride = 4.0

    # Deterministic anchor boxes (in image pixels), like a YOLO config.
    anchors = jnp.array([[10.0, 13.0], [16.0, 30.0], [33.0, 23.0]],
                        dtype=jnp.float32)

    key = jax.random.PRNGKey(0)
    p = 0.5 * jax.random.normal(key, (bs, nA * (nC + 5), nG, nG),
                                dtype=jnp.float32)

    io, p_perm = yolo_layer_forward(p, anchors, nC, img_size)
    io = jax.block_until_ready(io)
    p_perm = jax.block_until_ready(p_perm)

    io_ref, p_ref = yolo_layer_ref(p, anchors, nC, img_size)

    assert io.shape == (bs, nA * nG * nG, 5 + nC)
    assert p_perm.shape == (bs, nA, nG, nG, nC + 5)
    assert jnp.allclose(io, io_ref, rtol=1e-5, atol=1e-5)
    assert jnp.allclose(p_perm, p_ref, rtol=1e-6, atol=1e-6)

    print("KERNEL_OK")
</pallas_src>

<mosaic_0001>
module attributes {stable_mosaic.version = 11 : i64} {
  func.func @_yolo_kernel(%arg0: i32, %arg1: i32, %arg2: memref<24x1xf32, #tpu.memory_space<vmem>>, %arg3: memref<2x256xf32, #tpu.memory_space<vmem>>, %arg4: memref<1x24x256xf32, #tpu.memory_space<vmem>>, %arg5: memref<1x24x256xf32, #tpu.memory_space<vmem>>) attributes {dimension_semantics = [#tpu.dimension_semantics<parallel>, #tpu.dimension_semantics<parallel>], iteration_bounds = array<i64: 2, 1>, scalar_prefetch = 0 : i64, scratch_operands = 0 : i64, tpu.core_type = #tpu.core_type<tc>, window_params = [{pipeline_mode = #tpu.pipeline_mode<synchronous>, transform_indices = @transform_0, window_bounds = array<i64: 24, 1>}, {transform_indices = @transform_1, window_bounds = array<i64: 2, 256>}, {transform_indices = @transform_2, window_bounds = array<i64: 1, 24, 256>}, {transform_indices = @transform_3, window_bounds = array<i64: 1, 24, 256>}]} {
    %c0 = arith.constant 0 : index
    %c0_0 = arith.constant 0 : index
    %c0_1 = arith.constant 0 : index
    %0 = vector.load %arg4[%c0, %c0_0, %c0_1] : memref<1x24x256xf32, #tpu.memory_space<vmem>>, vector<1x24x256xf32>
    %1 = vector.shape_cast %0 : vector<1x24x256xf32> to vector<24x256xf32>
    %2 = arith.negf %1 : vector<24x256xf32>
    %3 = math.exp %2 : vector<24x256xf32>
    %cst = arith.constant 1.000000e+00 : f32
    %4 = vector.broadcast %cst : f32 to vector<24x256xf32>
    %5 = arith.addf %4, %3 : vector<24x256xf32>
    %6 = arith.divf %4, %5 : vector<24x256xf32>
    %c0_2 = arith.constant 0 : index
    %c0_3 = arith.constant 0 : index
    %7 = vector.load %arg3[%c0_2, %c0_3] : memref<2x256xf32, #tpu.memory_space<vmem>>, vector<1x256xf32>
    %c1 = arith.constant 1 : index
    %c0_4 = arith.constant 0 : index
    %8 = vector.load %arg3[%c1, %c0_4] : memref<2x256xf32, #tpu.memory_space<vmem>>, vector<1x256xf32>
    %c0_5 = arith.constant 0 : index
    %c0_6 = arith.constant 0 : index
    %9 = vector.load %arg2[%c0_5, %c0_6] : memref<24x1xf32, #tpu.memory_space<vmem>>, vector<24x1xf32>
    %cst_7 = arith.constant 1.000000e+00 : f32
    %10 = vector.broadcast %cst_7 : f32 to vector<24x1xf32>
    %11 = arith.cmpf oeq, %9, %10 : vector<24x1xf32>
    %cst_8 = arith.constant 2.000000e+00 : f32
    %12 = vector.broadcast %cst_8 : f32 to vector<24x1xf32>
    %13 = arith.cmpf olt, %9, %12 : vector<24x1xf32>
    %cst_9 = arith.constant 4.000000e+00 : f32
    %cst_10 = arith.constant 1.000000e+00 : f32
    %14 = vector.broadcast %cst_9 : f32 to vector<24x1xf32>
    %15 = vector.broadcast %cst_10 : f32 to vector<24x1xf32>
    %16 = arith.select %13, %14, %15 : vector<24x1xi1>, vector<24x1xf32>
    %cst_11 = arith.constant 4.000000e+00 : f32
    %cst_12 = arith.constant 0.000000e+00 : f32
    %17 = vector.broadcast %cst_11 : f32 to vector<24x1xf32>
    %18 = vector.broadcast %cst_12 : f32 to vector<24x1xf32>
    %19 = arith.select %13, %17, %18 : vector<24x1xi1>, vector<24x1xf32>
    %20 = vector.shape_cast %11 : vector<24x1xi1> to vector<24x1xi1>
    %21 = vector.broadcast %20 : vector<24x1xi1> to vector<24x256xi1>
    %22 = vector.shape_cast %8 : vector<1x256xf32> to vector<1x256xf32>
    %23 = vector.broadcast %22 : vector<1x256xf32> to vector<24x256xf32>
    %24 = vector.shape_cast %7 : vector<1x256xf32> to vector<1x256xf32>
    %25 = vector.broadcast %24 : vector<1x256xf32> to vector<24x256xf32>
    %26 = arith.select %21, %23, %25 : vector<24x256xi1>, vector<24x256xf32>
    %27 = vector.broadcast %16 : vector<24x1xf32> to vector<24x256xf32>
    %28 = arith.mulf %6, %27 : vector<24x256xf32>
    %29 = vector.broadcast %19 : vector<24x1xf32> to vector<24x256xf32>
    %30 = arith.mulf %26, %29 : vector<24x256xf32>
    %31 = arith.addf %28, %30 : vector<24x256xf32>
    %c0_13 = arith.constant 0 : index
    %c0_14 = arith.constant 0 : index
    %c0_15 = arith.constant 0 : index
    %32 = vector.load %arg5[%c0_13, %c0_14, %c0_15] : memref<1x24x256xf32, #tpu.memory_space<vmem>>, vector<1x24x256xf32>
    %33 = vector.shape_cast %32 : vector<1x24x256xf32> to vector<24x256xf32>
    %34 = vector.shape_cast %31 : vector<24x256xf32> to vector<1x24x256xf32>
    tpu.vector_store %arg5[%c0_13, %c0_14, %c0_15], %34 {strides = array<i32>} : memref<1x24x256xf32, #tpu.memory_space<vmem>>, vector<1x24x256xf32>,
    %35 = vector.extract_strided_slice %1 {offsets = [2, 0], sizes = [1, 256], strides = [1, 1]} : vector<24x256xf32> to vector<1x256xf32>
    %36 = math.exp %35 : vector<1x256xf32>
    %cst_16 = arith.constant 1.000000e+01 : f32
    %37 = vector.broadcast %cst_16 : f32 to vector<1x256xf32>
    %38 = arith.mulf %36, %37 : vector<1x256xf32>
    %c0_17 = arith.constant 0 : index
    %c2 = arith.constant 2 : index
    %c0_18 = arith.constant 0 : index
    %39 = vector.load %arg5[%c0_17, %c2, %c0_18] : memref<1x24x256xf32, #tpu.memory_space<vmem>>, vector<1x1x256xf32>
    %40 = vector.shape_cast %39 : vector<1x1x256xf32> to vector<1x256xf32>
    %41 = vector.shape_cast %38 : vector<1x256xf32> to vector<1x1x256xf32>
    tpu.vector_store %arg5[%c0_17, %c2, %c0_18], %41 {strides = array<i32>} : memref<1x24x256xf32, #tpu.memory_space<vmem>>, vector<1x1x256xf32>,
    %42 = vector.extract_strided_slice %1 {offsets = [3, 0], sizes = [1, 256], strides = [1, 1]} : vector<24x256xf32> to vector<1x256xf32>
    %43 = math.exp %42 : vector<1x256xf32>
    %cst_19 = arith.constant 1.300000e+01 : f32
    %44 = vector.broadcast %cst_19 : f32 to vector<1x256xf32>
    %45 = arith.mulf %43, %44 : vector<1x256xf32>
    %c0_20 = arith.constant 0 : index
    %c3 = arith.constant 3 : index
    %c0_21 = arith.constant 0 : index
    %46 = vector.load %arg5[%c0_20, %c3, %c0_21] : memref<1x24x256xf32, #tpu.memory_space<vmem>>, vector<1x1x256xf32>
    %47 = vector.shape_cast %46 : vector<1x1x256xf32> to vector<1x256xf32>
    %48 = vector.shape_cast %45 : vector<1x256xf32> to vector<1x1x256xf32>
    tpu.vector_store %arg5[%c0_20, %c3, %c0_21], %48 {strides = array<i32>} : memref<1x24x256xf32, #tpu.memory_space<vmem>>, vector<1x1x256xf32>,
    %49 = vector.extract_strided_slice %1 {offsets = [10, 0], sizes = [1, 256], strides = [1, 1]} : vector<24x256xf32> to vector<1x256xf32>
    %50 = math.exp %49 : vector<1x256xf32>
    %cst_22 = arith.constant 1.600000e+01 : f32
    %51 = vector.broadcast %cst_22 : f32 to vector<1x256xf32>
    %52 = arith.mulf %50, %51 : vector<1x256xf32>
    %c0_23 = arith.constant 0 : index
    %c10 = arith.constant 10 : index
    %c0_24 = arith.constant 0 : index
    %53 = vector.load %arg5[%c0_23, %c10, %c0_24] : memref<1x24x256xf32, #tpu.memory_space<vmem>>, vector<1x1x256xf32>
    %54 = vector.shape_cast %53 : vector<1x1x256xf32> to vector<1x256xf32>
    %55 = vector.shape_cast %52 : vector<1x256xf32> to vector<1x1x256xf32>
    tpu.vector_store %arg5[%c0_23, %c10, %c0_24], %55 {strides = array<i32>} : memref<1x24x256xf32, #tpu.memory_space<vmem>>, vector<1x1x256xf32>,
    %56 = vector.extract_strided_slice %1 {offsets = [11, 0], sizes = [1, 256], strides = [1, 1]} : vector<24x256xf32> to vector<1x256xf32>
    %57 = math.exp %56 : vector<1x256xf32>
    %cst_25 = arith.constant 3.000000e+01 : f32
    %58 = vector.broadcast %cst_25 : f32 to vector<1x256xf32>
    %59 = arith.mulf %57, %58 : vector<1x256xf32>
    %c0_26 = arith.constant 0 : index
    %c11 = arith.constant 11 : index
    %c0_27 = arith.constant 0 : index
    %60 = vector.load %arg5[%c0_26, %c11, %c0_27] : memref<1x24x256xf32, #tpu.memory_space<vmem>>, vector<1x1x256xf32>
    %61 = vector.shape_cast %60 : vector<1x1x256xf32> to vector<1x256xf32>
    %62 = vector.shape_cast %59 : vector<1x256xf32> to vector<1x1x256xf32>
    tpu.vector_store %arg5[%c0_26, %c11, %c0_27], %62 {strides = array<i32>} : memref<1x24x256xf32, #tpu.memory_space<vmem>>, vector<1x1x256xf32>,
    %63 = vector.extract_strided_slice %1 {offsets = [18, 0], sizes = [1, 256], strides = [1, 1]} : vector<24x256xf32> to vector<1x256xf32>
    %64 = math.exp %63 : vector<1x256xf32>
    %cst_28 = arith.constant 3.300000e+01 : f32
    %65 = vector.broadcast %cst_28 : f32 to vector<1x256xf32>
    %66 = arith.mulf %64, %65 : vector<1x256xf32>
    %c0_29 = arith.constant 0 : index
    %c18 = arith.constant 18 : index
    %c0_30 = arith.constant 0 : index
    %67 = vector.load %arg5[%c0_29, %c18, %c0_30] : memref<1x24x256xf32, #tpu.memory_space<vmem>>, vector<1x1x256xf32>
    %68 = vector.shape_cast %67 : vector<1x1x256xf32> to vector<1x256xf32>
    %69 = vector.shape_cast %66 : vector<1x256xf32> to vector<1x1x256xf32>
    tpu.vector_store %arg5[%c0_29, %c18, %c0_30], %69 {strides = array<i32>} : memref<1x24x256xf32, #tpu.memory_space<vmem>>, vector<1x1x256xf32>,
    %70 = vector.extract_strided_slice %1 {offsets = [19, 0], sizes = [1, 256], strides = [1, 1]} : vector<24x256xf32> to vector<1x256xf32>
    %71 = math.exp %70 : vector<1x256xf32>
    %cst_31 = arith.constant 2.300000e+01 : f32
    %72 = vector.broadcast %cst_31 : f32 to vector<1x256xf32>
    %73 = arith.mulf %71, %72 : vector<1x256xf32>
    %c0_32 = arith.constant 0 : index
    %c19 = arith.constant 19 : index
    %c0_33 = arith.constant 0 : index
    %74 = vector.load %arg5[%c0_32, %c19, %c0_33] : memref<1x24x256xf32, #tpu.memory_space<vmem>>, vector<1x1x256xf32>
    %75 = vector.shape_cast %74 : vector<1x1x256xf32> to vector<1x256xf32>
    %76 = vector.shape_cast %73 : vector<1x256xf32> to vector<1x1x256xf32>
    tpu.vector_store %arg5[%c0_32, %c19, %c0_33], %76 {strides = array<i32>} : memref<1x24x256xf32, #tpu.memory_space<vmem>>, vector<1x1x256xf32>,
    return
  }
  func.func @transform_0(%arg0: i32, %arg1: i32) -> (i32, i32) {
    %c0_i32 = arith.constant 0 : i32
    %c0_i32_0 = arith.constant 0 : i32
    %c0_i32_1 = arith.constant 0 : i32
    return %c0_i32, %c0_i32_0 : i32, i32
  }
  func.func @transform_1(%arg0: i32, %arg1: i32) -> (i32, i32) {
    %c0_i32 = arith.constant 0 : i32
    %c0_i32_0 = arith.constant 0 : i32
    return %c0_i32, %arg1 : i32, i32
  }
  func.func @transform_2(%arg0: i32, %arg1: i32) -> (i32, i32, i32) {
    %c0_i32 = arith.constant 0 : i32
    %c0_i32_0 = arith.constant 0 : i32
    return %arg0, %c0_i32, %arg1 : i32, i32, i32
  }
  func.func @transform_3(%arg0: i32, %arg1: i32) -> (i32, i32, i32) {
    %c0_i32 = arith.constant 0 : i32
    %c0_i32_0 = arith.constant 0 : i32
    return %arg0, %c0_i32, %arg1 : i32, i32, i32
  }
}

</mosaic_0001>

<bundles_post_ra>
// kernel: tpu_custom_call.1
= control target key start
LH: loop header
LB: loop body
LE: loop exit
PB: predicated region body
PF: predicated region fallthrough
CT: control target
= control target key end

     0   :  { %8 = vsyncpa [#allocation3], 0  ;;  %s1217_s0 = inlined_call_operand.vmem [shape: f32[24,1], index: 0, kind: input, shape index: {}]   ;;  %s1218_s1 = inlined_call_operand.vmem [shape: f32[2,256], index: 1, kind: input, shape index: {}]   ;;  %s1219_s2 = inlined_call_operand.hbm [shape: f32[2,24,256], index: 2, kind: input, shape index: {}]   ;;  %s1220_s3 = inlined_call_operand.hbm [shape: f32[2,24,256], index: 3, kind: output, shape index: {}]  }
   0x1   :  { %10 = vsyncpa [#allocation3 + $0x1], 0 }
   0x2   :  { %11 = vsyncpa [#allocation4], 0 }
   0x3   :  { %13 = vsyncpa [#allocation4 + $0x1], 0  ;;  %s963_s12 = smov 0   ;;  %s965_s13 = smov 0  }
   0x4   :  { %s967_s14 = smov 0   ;;  %s969_s15 = smov 0  }
   0x5   :  { %s971_s16 = smov 0   ;;  %s973_s17 = smov 0  }
   0x6 LB: > { %s669_s18 = sadd.s32 4294967295, %s931_s17   ;;  %s670_s19 = sadd.s32 4294967294, %s931_s17   ;;  %s931_s17 = sphi %s973_s17, %s19_s17   ;;  %s927_s16 = sphi %s971_s16, %s1237_s16   ;;  %s923_s15 = sphi %s969_s15, %s1236_s15   ;;  %s919_s14 = sphi %s967_s14, %s1235_s14   ;;  %s915_s13 = sphi %s965_s13, %s1234_s13   ;;  %s911_s12 = sphi %s963_s12, %s1233_s12  }
   0x7   : > { %s31_s20 = sadd.s32 1, %s927_s16  ;;  %s87_s21 = sadd.s32 1, %s919_s14 }
   0x8   : > { %p33_p0 = scmp.ge.s32.totalorder %s31_s20, 2  ;;  %p94_p1 = scmp.ne.s32.totalorder %s919_s14, %s915_s13 }
   0x9   : > { %p95_p2 = scmp.eq.s32.totalorder %s931_s17, 0  ;;  %p100_p3 = scmp.ne.s32.totalorder %s915_s13, %s911_s12 }
   0xa   : > { %s1239_s20 = smov (%p33_p0, %s31_s20), 0  ;;  %p101_p5 = scmp.eq.s32.totalorder %s669_s18, 0 }
   0xb   : > { %p1004_p4 = por %p95_p2, %p94_p1  ;;  %s82_s23 = ssub.s32 %s927_s16, %s1239_s20 }
   0xc   : > { %p126_p6 = scmp.eq.s32.totalorder %s669_s18, 1  ;;  %p85_p7 = scmp.eq.s32.totalorder %s82_s23, 0 }
   0xd   : > { %p1010_p8 = por %p101_p5, %p100_p3  ;;  %p132_p10 = scmp.eq.s32.totalorder %s670_s19, 1 }
   0xe   : > { %p1014_p9 = por %p126_p6, %p94_p1  ;;  %p708_p13 = scmp.lt.s32.totalorder %s931_s17, 2 }
   0xf   : > { %s1019_s26 = scalar_select %p85_p7, %s919_s14, %s87_s21  }
  0x10   : > { %s1224_s25 = scalar_select %p1014_p9, 1, 0 }
  0x11   : > { %p1021_p11 = por %p132_p10, %p100_p3  ;;  %s164_s28 = sand.u32 1, %s919_s14  }
  0x12   : > { %s692_s29 = smul.u32 48, %s164_s28  ;;  %p1031_p0 = pnand %p708_p13, %p1004_p4 }
  0x13   : > { %s1225_s27 = scalar_select %p1021_p11, 1, 0 }
  0x14   : > { %s693_s30 = smul.u32 768, %s927_s16  ;;  %s168_s8 = scalar_lea.vmem [#allocation2], %s692_s29 }
  0x15   : > { %s177_s9 = sshll.u32 %s168_s8, 4  ;;  %s1043_s10 = scalar_lea.sflag [#allocation3], %s164_s28  ;;  %s1040_s9 = int_to_ptr.vmem [resolvable:$true] %s177_s9 }
  0x16   : > { %s1038_s7 = scalar_lea.hbm %s1219_s2, %s693_s30  ;;  %p821_p3 = pneg %p1031_p0 }
  0x17   : > { %s819_s11 = scalar_lea.hbm %s1038_s7, 768  ;;  %s824_s21 = scalar_lea.hbm %s1219_s2, 1536 }
  0x18   : > { %p820_p2 = scmp.ne.s32.totalorder %s1038_s7, %s819_s11  ;;  %p825_p6 = scmp.lt.u32.totalorder %s1038_s7, %s1219_s2 }
  0x19   : > { %p826_p7 = scmp.lt.u32.totalorder %s824_s21, %s819_s11  ;;  %p828_p13 = scmp.lt.u32.totalorder %s819_s11, %s1038_s7 }
  0x1a   : > { %p822_p4 = pnand %p821_p3, %p820_p2 }
  0x1b   : > { %p827_p10 = por %p826_p7, %p825_p6 }
  0x1c   : > { %p823_p5 = pneg %p822_p4 }
  0x1d   : > { %p829_p12 = por %p828_p13, %p827_p10 }
  0x1f   : > { %p830_p1 = pnand %p829_p12, %p823_p5 }
  0x21   : > { %833 = shalt.err (!%p830_p1)
}
  0x22   : > { %s834_s28 = scalar_lea.vmem %s1040_s9, 768  ;;  %s933_s29 = smov [#allocation2]  }
  0x23   : > { %p835_p2 = scmp.ne.s32.totalorder %s1040_s9, %s834_s28  ;;  %s839_s30 = sshll.u32 %s933_s29, 4  ;;  %s840_s30 = int_to_ptr.vmem [resolvable:$false] %s839_s30 }
  0x24   : > { %s841_s5 = scalar_lea.vmem %s840_s30, 1536  ;;  %p842_p9 = scmp.lt.s32.totalorder %s1040_s9, %s840_s30 }
  0x25   : > { %p837_p4 = pnand %p835_p2, %p821_p3  ;;  %p843_p6 = scmp.lt.s32.totalorder %s841_s5, %s834_s28 }
  0x27   : > { %p838_p11 = pneg %p837_p4  ;;  %p844_p7 = por %p843_p6, %p842_p9 }
  0x29   : > { %p845_p10 = pnand %p844_p7, %p838_p11 }
  0x2b   : > { %848 = shalt.err (!%p845_p10)
}
  0x2c   : > { %s934_s6 = smov 256   ;;  %s935_s8 = smov 16  }
  0x2d   : > { %703 = dma.hbm_to_vmem [thread:$0]  (!%p1031_p0), %s1038_s7, 768, %s1040_s9, %s1043_s10, %s934_s6, %s934_s6, %s935_s8  }
  0x2e   : > { %p185_p12 = scmp.lt.s32.totalorder %s931_s17, 3  ;;  %p1227_p1 = scmp.ge.s32.totalorder %s931_s17, 1 }
  0x30   : > { %p186_p3 = pnand %p1227_p1, %p185_p12 }
  0x31   : > { %s1075_s11 = sand.u32 (!%p186_p3), 1, %s915_s13  }
  0x32   : > { %189 = sbr.rel (%p186_p3) target bundleno = 223 (0xdf), region = 32  ;;  %s192_s19 = scalar_lea.sflag (!%p186_p3), [#allocation3], %s1075_s11 }
  0x33   : > { %s694_s18 = smul.u32 (!%p186_p3), 48, %s1075_s11 }
  0x35   : > { %s1081_s21 = scalar_lea.vmem (!%p186_p3), [#allocation2], %s694_s18 }
  0x39   : > { %902 = dma.done.wait (%p1010_p8), %s192_s19, 768  }
  0x3a   : > { %904 = vsyncadd (%p1010_p8), %s192_s19, 4294966528  ;;  %v936_v0 = vmov 0   ;;  %v278_v1 = vld [vmem:[%s1217_s0 + $0x10] sm:$0xff]  ;;  %v276_v2 = vld [vmem:[%s1217_s0] sm:$0xff]  ;;  %v937_v5 = vmov 1.0   ;;  %v938_v8 = vmov 0.0   ;;  %v307_v41 = vlaneseq }
  0x3b   : > { %767 = vset.pattern.permute.xlu1 %v936_v0  ;;  %766 = vset.pattern.permute.xlu0 %v936_v0  ;;  %v277_v3 = vld [vmem:[%s1217_s0 + $0x8] sm:$0xff]  ;;  %vm281_vm0 = vcmp.eq.f32.partialorder %v278_v1, 1.0  ;;  %vm284_vm1 = vcmp.lt.f32.partialorder %v278_v1, 2.0  ;;  %vm279_vm2 = vcmp.eq.f32.partialorder %v276_v2, 1.0  ;;  %vm282_vm3 = vcmp.lt.f32.partialorder %v276_v2, 2.0  ;;  %v231_v18 = vld [vmem:[%s1081_s21] sm:$0xff] }
  0x3c   : > { %v293_v4 = vsel %vm281_vm0, 1, %v936_v0  ;;  %v285_v6 = vsel %vm282_vm3, 4.0, %v937_v5  ;;  %v291_v7 = vsel %vm279_vm2, 1, %v936_v0  ;;  %vm283_vm4 = vcmp.lt.f32.partialorder %v277_v3, 2.0  ;;  %v232_v19 = vld [vmem:[%s1081_s21 + $0x8] sm:$0xff]  ;;  %v233_v21 = vld [vmem:[%s1081_s21 + $0x10] sm:$0xff] }
  0x3d   : > { %301 = vperm.xlu1 %767, %v293_v4   ;;  %vm280_vm5 = vcmp.eq.f32.partialorder %v277_v3, 1.0  ;;  %v290_v9 = vsel %vm284_vm1, 4.0, %v938_v8  ;;  %295 = vperm.xlu0 %766, %v291_v7   ;;  %v286_v10 = vsel %vm283_vm4, 4.0, %v937_v5  ;;  %v289_v11 = vsel %vm283_vm4, 4.0, %v938_v8  ;;  %v234_v23 = vld [vmem:[%s1081_s21 + $0x18] sm:$0xff]  ;;  %v235_v29 = vld [vmem:[%s1081_s21 + $0x20] sm:$0xff] }
  0x3e   : > { %v287_v12 = vsel %vm284_vm1, 4.0, %v937_v5  ;;  %v288_v13 = vsel %vm282_vm3, 4.0, %v938_v8  ;;  %v768_v14 = vpack.i.bf16 %v286_v10, %v285_v6  ;;  %v292_v15 = vsel %vm280_vm5, 1, %v936_v0  ;;  %v236_v30 = vld [vmem:[%s1081_s21 + $0x28] sm:$0xff]  ;;  %s695_s5 = smul.u32 768, %s923_s15  ;;  %s222_s6 = scalar_lea.vmem [#allocation5], %s694_s18 }
  0x3f   : > { %v778_v16 = vpack.i.bf16 %v290_v9, %v289_v11  ;;  %v773_v17 = vpack.i.bf16 %v288_v13, %v287_v12  ;;  %v388_v20 = vmul.f32 1.442695, %v231_v18  ;;  %v390_v22 = vmul.f32 1.442695, %v232_v19  ;;  %s567_s8 = sshll.u32 %s222_s6, 4  ;;  %s552_s18 = scalar_lea.sflag [#allocation4], %s1075_s11  ;;  %s1156_s8 = int_to_ptr.vmem [resolvable:$true] %s567_s8 }
  0x40   : > { %v445_v24 = vmul.f32 1.442695, %v233_v21  ;;  %v447_v25 = vmul.f32 1.442695, %v234_v23  ;;  %v676_v26 = vmul.f32 -1.442695, %v231_v18  ;;  %s1154_s21 = scalar_lea.hbm %s1220_s3, %s695_s5 }
  0x41   : > { %769 = vperm.xlu1 %767, %v768_v14   ;;  %298 = vperm.xlu0 %766, %v292_v15   ;;  %783 = vpow2.f32 %v388_v20  ;;  %v677_v27 = vmul.f32 -1.442695, %v232_v19  ;;  %v678_v28 = vmul.f32 -1.442695, %v233_v21  ;;  %v498_v31 = vmul.f32 1.442695, %v235_v29 }
  0x42   : > { %785 = vpow2.f32 %v390_v22  ;;  %v500_v32 = vmul.f32 1.442695, %v236_v30  ;;  %v679_v33 = vmul.f32 -1.442695, %v234_v23  ;;  %v680_v34 = vmul.f32 -1.442695, %v235_v29 }
  0x43   : > { %787 = vpow2.f32 %v445_v24  ;;  %v681_v35 = vmul.f32 -1.442695, %v236_v30  ;;  %v939_v37 = vmov 1966171168   ;;  %v308_v49 = vshrl.u32 %v307_v41, 7  ;;  %s849_s4 = scalar_lea.vmem %s1156_s8, 768 }
  0x44   : > { %789 = vpow2.f32 %v447_v25  ;;  %v398_v38 = vunpack.c.l.s4 %v939_v37  ;;  %v682_v25 = vld [vmem:[%s1218_s1 + $0x1] ss:$2 sm:$0x3]  ;;  %vm1130_vm7 = vcmp.lt.s32.totalorder %v307_v41, 256  ;;  %p850_p8 = scmp.ne.s32.totalorder %s1156_s8, %s849_s4  ;;  %p1230_p9 = scmp.ne.s32.totalorder %s1224_s25, 0 }
  0x45   : > { %779 = vperm.xlu1 %767, %v778_v16   ;;  %774 = vperm.xlu0 %766, %v773_v17   ;;  %791 = vpow2.f32 %v676_v26  ;;  %v309_v15 = vsub.s32 0, %v308_v49  ;;  %v273_v17 = vld [vmem:[%s1218_s1] ss:$2 sm:$0x3]  ;;  %v313_v22 = vsub.s32 1, %v308_v49  ;;  %s940_s7 = smov [#allocation5]  }
  0x46   : > { %793 = vpow2.f32 %v677_v27  ;;  %v399_v44 = vunpack.c.0.s8 %v398_v38  ;;  %p851_p11 = pnand %p850_p8, %p1230_p9  ;;  %s853_s9 = sshll.u32 %s940_s7, 4  ;;  %s854_s9 = int_to_ptr.vmem [resolvable:$false] %s853_s9 }
  0x47   : > { %795 = vpow2.f32 %v678_v28  ;;  %v321_v26 = vrot.slane %v273_v17, %v309_v15  ;;  %v325_v37 = vrot.slane %v273_v17, %v313_v22  ;;  %s855_s10 = scalar_lea.vmem %s854_s9, 1536  ;;  %p856_p5 = scmp.lt.s32.totalorder %s1156_s8, %s854_s9 }
  0x48   : > { %797 = vpow2.f32 %v498_v31  ;;  %v1103_v54 = vsub.s32 %v399_v44, %v308_v49  ;;  %p852_p0 = pneg %p851_p11  ;;  %p857_p13 = scmp.lt.s32.totalorder %s855_s10, %s849_s4 }
  0x49   : > { %799 = vpow2.f32 %v500_v32 }
  0x4a   : > { %801 = vpow2.f32 %v679_v33  ;;  %p858_p2 = por %p857_p13, %p856_p5 }
  0x4b   : > { %v784_v36 = vpop.eup %783  ;;  %803 = vpow2.f32 %v680_v34 }
  0x4c   : > { %v786_v39 = vpop.eup %785  ;;  %805 = vpow2.f32 %v681_v35  ;;  %v420_v46 = vmul.f32 13.0, %v784_v36  ;;  %v392_v58 = vmul.f32 10.0, %v784_v36  ;;  %v310_v35 = vrot.slane %v682_v25, %v309_v15  ;;  %p859_p4 = pnand %p858_p2, %p852_p0 }
  0x4d   : > { %v788_v40 = vpop.eup %787  ;;  %v421_v47 = vmul.f32 13.0, %v786_v39  ;;  %v393_v59 = vmul.f32 10.0, %v786_v39  ;;  %v314_v36 = vrot.slane %v682_v25, %v313_v22 }
  0x4e   : > { %v790_v42 = vpop.eup %789  ;;  %v473_v50 = vmul.f32 30.0, %v788_v40  ;;  %v449_v62 = vmul.f32 16.0, %v788_v40 }
  0x4f   : > { %v792_v43 = vpop.eup %791  ;;  %v474_v51 = vmul.f32 30.0, %v790_v42  ;;  %v424_v60 = vcombine.low %v420_v46, %v421_v47  ;;  %v450_v63 = vmul.f32 16.0, %v790_v42  ;;  %v396_v6 = vcombine.low %v392_v58, %v393_v59 }
  0x50   : > { %v794_v45 = vpop.eup %793  ;;  %v255_v55 = vadd.f32 1.0, %v792_v43 }
  0x51   : > { %v796_v48 = vpop.eup %795  ;;  %v256_v57 = vadd.f32 1.0, %v794_v45  ;;  %v477_v0 = vcombine.low %v473_v50, %v474_v51  ;;  %v431_v7 = vrot.slane %v424_v60, %v1103_v54  ;;  %v453_v9 = vcombine.low %v449_v62, %v450_v63 }
  0x52   : > { %v798_v52 = vpop.eup %797  ;;  %v257_v1 = vadd.f32 1.0, %v796_v48  ;;  %807 = vrcp.f32 %v255_v55  ;;  %v403_v16 = vrot.slane %v396_v6, %v1103_v54 }
  0x53   : > { %v800_v53 = vpop.eup %799  ;;  %v526_v2 = vmul.f32 23.0, %v798_v52  ;;  %809 = vrcp.f32 %v256_v57  ;;  %v484_v10 = vrot.slane %v477_v0, %v1103_v54  ;;  %v502_v11 = vmul.f32 33.0, %v798_v52 }
  0x54   : > { %v802_v56 = vpop.eup %801  ;;  %v527_v3 = vmul.f32 23.0, %v800_v53  ;;  %v503_v12 = vmul.f32 33.0, %v800_v53  ;;  %811 = vrcp.f32 %v257_v1  ;;  %v432_v18 = vcombine.high %v431_v7, %v431_v7 }
  0x55   : > { %v804_v61 = vpop.eup %803  ;;  %v258_v5 = vadd.f32 1.0, %v802_v56  ;;  %v460_v19 = vrot.slane %v453_v9, %v1103_v54  ;;  %v485_v20 = vcombine.high %v484_v10, %v484_v10  ;;  %v1117_v28 = vrot.slane %v403_v16, %v1103_v54 }
  0x56   : > { %v806_v4 = vpop.eup %805  ;;  %v259_v8 = vadd.f32 1.0, %v804_v61  ;;  %v530_v14 = vcombine.low %v526_v2, %v527_v3  ;;  %v506_v21 = vcombine.low %v502_v11, %v503_v12  ;;  %v1126_v32 = vrot.slane %v432_v18, %v1103_v54 }
  0x57   : > { %v260_v13 = vadd.f32 1.0, %v806_v4  ;;  %813 = vrcp.f32 %v258_v5  ;;  %v1120_v30 = vrot.slane %v460_v19, %v1103_v54  ;;  %v1123_v31 = vrot.slane %v485_v20, %v1103_v54 }
  0x58   : > { %815 = vrcp.f32 %v259_v8  ;;  %v537_v23 = vrot.slane %v530_v14, %v1103_v54  ;;  %v513_v33 = vrot.slane %v506_v21, %v1103_v54  ;;  %v411_v46 = vcombine.high %v1117_v28, %v1117_v28 }
  0x59   : > { %817 = vrcp.f32 %v260_v13  ;;  %v468_v48 = vcombine.high %v1120_v30, %v1120_v30  ;;  %v493_v49 = vcombine.high %v1123_v31, %v1123_v31  ;;  %v440_v41 = vcombine.high %v1126_v32, %v1126_v32 }
  0x5a   : > { %v538_v38 = vcombine.high %v537_v23, %v537_v23  ;;  %v520_v50 = vrot.slane %v513_v33, %v1103_v54 }
  0x5c   : > { %v808_v29 = vpop.eup %807  ;;  %v545_v55 = vrot.slane %v538_v38, %v1103_v54  ;;  %v521_v16 = vcombine.high %v520_v50, %v520_v50 }
  0x5d   : > { %v810_v34 = vpop.eup %809 }
  0x5e   : > { %v812_v40 = vpop.eup %811  ;;  %v546_v17 = vcombine.high %v545_v55, %v545_v55 }
  0x61   : > { %v814_v47 = vpop.eup %813 }
  0x62   : > { %v816_v51 = vpop.eup %815 }
  0x63   : > { %v818_v61 = vpop.eup %817 }
  0xbc   : > { %v302_v24 = vpop.permute.xlu1 %301  ;;  %v296_v27 = vpop.permute.xlu0 %295 }
  0xbd   : > { %vm305_vm6 = vcmp.eq.s32.totalorder %v302_v24, 1  ;;  %vm303_vm8 = vcmp.eq.s32.totalorder %v296_v27, 1 }
  0xbe   : > { %v332_v52 = vsel %vm305_vm6, %v310_v35, %v321_v26  ;;  %v333_v53 = vsel %vm305_vm6, %v314_v36, %v325_v37  ;;  %v328_v56 = vsel %vm303_vm8, %v310_v35, %v321_v26  ;;  %v329_v57 = vsel %vm303_vm8, %v314_v36, %v325_v37 }
  0xc0   : > { %v770_v39 = vpop.permute.xlu1 %769  ;;  %v299_v45 = vpop.permute.xlu0 %298 }
  0xc1   : > { %v772_v43 = vunpack.i.h.bf16 %v770_v39  ;;  %v771_v44 = vunpack.i.l.bf16 %v770_v39  ;;  %vm304_vm9 = vcmp.eq.s32.totalorder %v299_v45, 1 }
  0xc2   : > { %v330_v3 = vsel %vm304_vm9, %v310_v35, %v321_v26  ;;  %v331_v4 = vsel %vm304_vm9, %v314_v36, %v325_v37 }
  0xc3   : > { %v349_v58 = vmul.f32 %v808_v29, %v771_v44  ;;  %v350_v59 = vmul.f32 %v810_v34, %v771_v44  ;;  %v351_v62 = vmul.f32 %v812_v40, %v772_v43  ;;  %v352_v63 = vmul.f32 %v814_v47, %v772_v43 }
  0xc4   : > { %v780_v60 = vpop.permute.xlu1 %779  ;;  %v775_v2 = vpop.permute.xlu0 %774 }
  0xc5   : > { %v782_v0 = vunpack.i.h.bf16 %v780_v60  ;;  %v781_v1 = vunpack.i.l.bf16 %v780_v60  ;;  %v777_v5 = vunpack.i.h.bf16 %v775_v2  ;;  %v776_v6 = vunpack.i.l.bf16 %v775_v2 }
  0xc7   : > { %v372_v54 = vmul.f32 %v781_v1, %v330_v3  ;;  %v373_v7 = vmul.f32 %v781_v1, %v331_v4  ;;  %v374_v8 = vmul.f32 %v782_v0, %v332_v52  ;;  %v375_v9 = vmul.f32 %v782_v0, %v333_v53 }
  0xc8   : > { %v353_v10 = vmul.f32 %v816_v51, %v776_v6  ;;  %v354_v11 = vmul.f32 %v818_v61, %v776_v6  ;;  %v370_v12 = vmul.f32 %v777_v5, %v328_v56  ;;  %v371_v13 = vmul.f32 %v777_v5, %v329_v57 }
  0xc9   : > { %v378_v14 = vadd.f32 %v372_v54, %v351_v62  ;;  %v379_v15 = vadd.f32 %v373_v7, %v352_v63 }
  0xca   : > { %v376_v18 = vadd.f32 %v370_v12, %v349_v58  ;;  %v377_v19 = vadd.f32 %v371_v13, %v350_v59  ;;  %v380_v20 = vadd.f32 %v374_v8, %v353_v10  ;;  %v381_v21 = vadd.f32 %v375_v9, %v354_v11 }
  0xcb   : > { %384 = vst [vmem:[%s222_s6 + $0x10] sm:$0xff] %v378_v14  ;;  %385 = vst [vmem:[%s222_s6 + $0x18] sm:$0xff] %v379_v15 }
  0xcc   : > { %685 = vst.msk [vmem:[%s222_s6 + $0x12] ss:$8 sm:$0x3] %vm1130_vm7, %v468_v48  ;;  %686 = vst.msk [vmem:[%s222_s6 + $0x13] ss:$8 sm:$0x3] %vm1130_vm7, %v493_v49 }
  0xcd   : > { %382 = vst [vmem:[%s222_s6] sm:$0xff] %v376_v18  ;;  %383 = vst [vmem:[%s222_s6 + $0x8] sm:$0xff] %v377_v19 }
  0xce   : > { %386 = vst [vmem:[%s222_s6 + $0x20] sm:$0xff] %v380_v20  ;;  %387 = vst [vmem:[%s222_s6 + $0x28] sm:$0xff] %v381_v21 }
  0xcf   : > { %683 = vst.msk [vmem:[%s222_s6 + $0x2] ss:$8 sm:$0x3] %vm1130_vm7, %v411_v46  ;;  %684 = vst.msk [vmem:[%s222_s6 + $0x3] ss:$8 sm:$0x3] %vm1130_vm7, %v440_v41 }
  0xd0   : > { %687 = vst.msk [vmem:[%s222_s6 + $0x22] ss:$8 sm:$0x3] %vm1130_vm7, %v521_v16  ;;  %688 = vst.msk [vmem:[%s222_s6 + $0x23] ss:$8 sm:$0x3] %vm1130_vm7, %v546_v17 }
  0xd1   : > { %862 = shalt.err (!%p859_p4)
}
  0xd2   : > { %s863_s22 = scalar_lea.hbm %s1154_s21, 768  ;;  %s867_s28 = scalar_lea.hbm %s1220_s3, 1536 }
  0xd3   : > { %p864_p6 = scmp.ne.s32.totalorder %s1154_s21, %s863_s22  ;;  %p868_p12 = scmp.lt.u32.totalorder %s1154_s21, %s1220_s3 }
  0xd4   : > { %p869_p1 = scmp.lt.u32.totalorder %s867_s28, %s863_s22  ;;  %p871_p8 = scmp.lt.u32.totalorder %s863_s22, %s1154_s21 }
  0xd5   : > { %p865_p7 = pnand %p864_p6, %p1230_p9 }
  0xd6   : > { %p870_p3 = por %p869_p1, %p868_p12 }
  0xd7   : > { %p866_p10 = pneg %p865_p7 }
  0xd8   : > { %p872_p11 = por %p871_p8, %p870_p3 }
  0xda   : > { %p873_p0 = pnand %p872_p11, %p866_p10 }
  0xdc   : > { %876 = shalt.err (!%p873_p0)
}
  0xdd   : > { %s941_s5 = smov 256   ;;  %s942_s6 = smov 16  }
  0xde   : > { %698 = dma.vmem_to_hbm [thread:$0]  (%p1230_p9), %s1156_s8, 768, %s1154_s21, %s552_s18, %s941_s5, %s941_s5, %s942_s6  }
  0xdf PF: > { %s582_s15 = sand.u32 1, %s911_s12   ;;  %p1231_p5 = scmp.ne.s32.totalorder %s1225_s27, 0 }
  0xe0   : > { %p1232_p13 = scmp.ge.s32.totalorder %s931_s17, 2  ;;  %s583_s19 = scalar_lea.sflag [#allocation4], %s582_s15 }
  0xe2   : > { %p705_p2 = pnand %p1232_p13, %p1231_p5 }
  0xe4   : > { %906 = dma.done.wait (!%p705_p2), %s583_s19, 768  }
  0xe5   : > { %908 = vsyncadd (!%p705_p2), %s583_s19, 4294966528  ;;  %s19_s17 = sadd.s32 1, %s931_s17   ;;  %s1233_s12 = smov %s915_s13 }
  0xe6   : > { %p16_p4 = scmp.ge.s32.totalorder %s19_s17, 4   ;;  %s1234_s13 = smov %s919_s14 }
  0xe7   : > { %s1235_s14 = smov %s1019_s26  ;;  %s1236_s15 = smov %s927_s16 }
  0xe8   : > { %s1237_s16 = smov %s1239_s20  ;;  %18 = sbr.rel (!%p16_p4) target bundleno = 6 (0x6), region = 87 }
  0xef   :  { %588 = vsyncpa [#allocation3], 1 }
  0xf0   :  { %590 = vsyncpa [#allocation3 + $0x1], 1 }
  0xf1   :  { %591 = vsyncpa [#allocation4], 1 }
  0xf2   :  { %593 = vsyncpa [#allocation4 + $0x1], 1 }

</bundles_post_ra>
